<compile_context>
chip_gen: v7x
topology: tpu7x:2x2x1
jax: 0.10.0
libtpu: 0.0.40
codegen_flags: <defaults>
</compile_context>

<pallas_src>
import functools

import jax
import jax.numpy as jnp
from jax import lax
from jax.experimental import pallas as pl
from jax.experimental.pallas import tpu as pltpu

_LANE = 128


def _round_up(x, m):
    return ((x + m - 1) // m) * m


def _pick_tile(n, max_tile):
    """Largest legal tile <= max_tile: either the full dim or a mult-of-8 divisor."""
    if n <= max_tile:
        return n
    for t in range(min(max_tile, n), 0, -1):
        if n % t == 0 and t % 8 == 0:
            return t
    return n  # fall back to the full dim (always legal)


def _spectral_kernel(u_ref, w_ref, o_ref):
    """One (batch-tile, C_out-tile) step of the spectral contraction.

    u_ref : (2, Ci, TB, Mp)   [real, imag] spectral slice, batch on sublanes
    w_ref : (3, Ci, TCo, Mp)  Gauss combos [wr, wi - wr, wr + wi]
    o_ref : (2, TB, TCo, Mp)  [real, imag] output, lane-dense Mp
    """
    _, ci, tb, mp = u_ref.shape
    tco = w_ref.shape[2]

    # Batch rows outer (only one pair of (TCo, Mp) accumulators live at a time),
    # C_in unrolled inner: every load is a contiguous tile or a (1, Mp) row that
    # broadcasts over the TCo sublanes of the accumulator.
    for b in range(tb):
        acc_r = jnp.zeros((tco, mp), jnp.float32)
        acc_i = jnp.zeros((tco, mp), jnp.float32)
        for c in range(ci):
            ur = u_ref[0, c, pl.ds(b, 1), :]          # (1, Mp)
            ui = u_ref[1, c, pl.ds(b, 1), :]          # (1, Mp)
            wa = w_ref[0, c]                          # (TCo, Mp)  wr
            wb = w_ref[1, c]                          # (TCo, Mp)  wi - wr
            wc = w_ref[2, c]                          # (TCo, Mp)  wr + wi
            # 3-multiply complex product (Gauss):
            #   k1 = (ur + ui) * wr ; real = k1 - ui*(wr+wi) ; imag = k1 + ur*(wi-wr)
            k1 = (ur + ui) * wa
            acc_r = acc_r + (k1 - ui * wc)
            acc_i = acc_i + (k1 + ur * wb)
        o_ref[0, b, :, :] = acc_r
        o_ref[1, b, :, :] = acc_i


def _spectral_mul_pallas(u_pack, w_pack):
    """u_pack: (2, Ci, B, Mp) f32; w_pack: (3, Ci, Co, Mp) f32 -> (2, B, Co, Mp) f32."""
    _, Ci, B, Mp = u_pack.shape
    Co = w_pack.shape[2]

    TB = _pick_tile(B, 8)
    TCo = _pick_tile(Co, 32)
    grid = (B // TB, Co // TCo)

    u_spec = pl.BlockSpec((2, Ci, TB, Mp), lambda b, c: (0, 0, b, 0))
    w_spec = pl.BlockSpec((3, Ci, TCo, Mp), lambda b, c: (0, 0, c, 0))
    o_spec = pl.BlockSpec((2, TB, TCo, Mp), lambda b, c: (0, b, c, 0))

    # Explicit VMEM budget: double-buffered blocks + headroom, clamped so it
    # stays within every generation's physical VMEM (v7x: 64 MiB / core).
    block_bytes = 4 * (2 * Ci * TB * Mp + 3 * Ci * TCo * Mp + 2 * TB * TCo * Mp)
    vmem_limit = int(min(max(4 * block_bytes + (8 << 20), 16 << 20), 64 << 20))

    return pl.pallas_call(
        _spectral_kernel,
        grid=grid,
        in_specs=[u_spec, w_spec],
        out_specs=o_spec,
        out_shape=jax.ShapeDtypeStruct((2, B, Co, Mp), jnp.float32),
        compiler_params=pltpu.CompilerParams(
            dimension_semantics=("parallel", "parallel"),
            vmem_limit_bytes=vmem_limit,
        ),
    )(u_pack, w_pack)


def precompute_spectral_weights(weights1, weights2):
    """Parameter-only preprocessing, hoisted out of the forward path (do once).

    weights1/2: (Ci, Co, m1, m2) complex64 -> (3, Ci, Co, Mp) float32 holding
    the Gauss-trick combos [wr, wi - wr, wr + wi], lane-padded to 128.
    """
    Ci, Co, m1, m2 = weights1.shape
    M = 2 * m1 * m2
    Mp = max(_round_up(M, _LANE), _LANE)
    w_st = jnp.concatenate([weights1, weights2], axis=2)             # (Ci, Co, 2*m1, m2)
    wr = jnp.real(w_st).reshape(Ci, Co, M).astype(jnp.float32)
    wi = jnp.imag(w_st).reshape(Ci, Co, M).astype(jnp.float32)
    w_pack = jnp.stack([wr, wi - wr, wr + wi], axis=0)               # (3, Ci, Co, M)
    if Mp > M:
        w_pack = jnp.pad(w_pack, ((0, 0), (0, 0), (0, 0), (0, Mp - M)))
    return w_pack


@functools.partial(jax.jit, static_argnames=("modes1", "modes2"))
def spectral_conv2d_forward(u, w_pack, modes1, modes2):
    """Default path of SpectralConv2d.forward (x_in=None, x_out=None).

    u      : (B, C_in, H, W) float32
    w_pack : (3, C_in, C_out, Mp) float32 from precompute_spectral_weights
    returns: (B, C_out, H, W) float32
    """
    B, Ci, H, W = u.shape
    Co = w_pack.shape[2]
    Mp = w_pack.shape[3]
    M = 2 * modes1 * modes2

    # TODO(synk): rfft2/irfft2 have no Pallas TPU primitive; kept as jnp.fft glue.
    u_ft = jnp.fft.rfft2(u)                                    # (B, Ci, H, W//2+1) c64

    # Gather the two retained mode corners, stack along the x-axis.
    u1 = u_ft[:, :, :modes1, :modes2]
    u2 = u_ft[:, :, H - modes1:, :modes2]
    u_sl = jnp.concatenate([u1, u2], axis=2).reshape(B, Ci, M)  # (B, Ci, M)

    ur = jnp.real(u_sl).astype(jnp.float32)
    ui = jnp.imag(u_sl).astype(jnp.float32)
    u_pack = jnp.stack([ur, ui], axis=0)                        # (2, B, Ci, M)
    u_pack = jnp.transpose(u_pack, (0, 2, 1, 3))                # (2, Ci, B, M)
    if Mp > M:
        u_pack = jnp.pad(u_pack, ((0, 0), (0, 0), (0, 0), (0, Mp - M)))

    out_pack = _spectral_mul_pallas(u_pack, w_pack)             # (2, B, Co, Mp)
    out = (out_pack[0, :, :, :M] + 1j * out_pack[1, :, :, :M]).astype(jnp.complex64)
    out = out.reshape(B, Co, 2 * modes1, modes2)
    factor1 = out[:, :, :modes1, :]
    factor2 = out[:, :, modes1:, :]

    out_ft = jnp.zeros((B, Co, H, W // 2 + 1), dtype=jnp.complex64)
    out_ft = lax.dynamic_update_slice(out_ft, factor1, (0, 0, 0, 0))
    out_ft = lax.dynamic_update_slice(out_ft, factor2, (0, 0, H - modes1, 0))

    return jnp.fft.irfft2(out_ft, s=(H, W)).astype(jnp.float32)


def _reference_forward(u, weights1, weights2, modes1, modes2):
    """Pure-jnp mirror of the PyTorch forward (default x_in/x_out=None path)."""
    B, Ci, H, W = u.shape
    Co = weights1.shape[1]
    u_ft = jnp.fft.rfft2(u)
    f1 = jnp.einsum('bixy,ioxy->boxy', u_ft[:, :, :modes1, :modes2], weights1)
    f2 = jnp.einsum('bixy,ioxy->boxy', u_ft[:, :, H - modes1:, :modes2], weights2)
    out_ft = jnp.zeros((B, Co, H, W // 2 + 1), dtype=jnp.complex64)
    out_ft = out_ft.at[:, :, :modes1, :modes2].set(f1)
    out_ft = out_ft.at[:, :, H - modes1:, :modes2].set(f2)
    return jnp.fft.irfft2(out_ft, s=(H, W))


if __name__ == "__main__":
    # Small, module-consistent shapes.
    B, Ci, Co = 2, 4, 4
    H = W = 16
    modes1 = modes2 = 4

    key = jax.random.PRNGKey(0)
    ku, k1r, k1i, k2r, k2i = jax.random.split(key, 5)

    u = jax.random.normal(ku, (B, Ci, H, W), dtype=jnp.float32)

    # weights = scale * torch.rand(..., dtype=cfloat): uniform[0,1) real & imag.
    scale = 1.0 / (Ci * Co)
    wshape = (Ci, Co, modes1, modes2)
    weights1 = (scale * (jax.random.uniform(k1r, wshape)
                         + 1j * jax.random.uniform(k1i, wshape))).astype(jnp.complex64)
    weights2 = (scale * (jax.random.uniform(k2r, wshape)
                         + 1j * jax.random.uniform(k2i, wshape))).astype(jnp.complex64)

    # Parameter-only preprocessing done once (cached like a parameter).
    w_pack = jax.block_until_ready(precompute_spectral_weights(weights1, weights2))

    out = spectral_conv2d_forward(u, w_pack, modes1, modes2)
    out = jax.block_until_ready(out)

    ref = _reference_forward(u, weights1, weights2, modes1, modes2)
    assert out.shape == (B, Co, H, W)
    assert jnp.allclose(out, ref, atol=1e-5, rtol=1e-5)

    print("KERNEL_OK")
</pallas_src>

<mosaic_0001>
module attributes {stable_mosaic.version = 11 : i64} {
  func.func @_spectral_kernel(%arg0: i32, %arg1: i32, %arg2: memref<2x4x2x128xf32, #tpu.memory_space<vmem>>, %arg3: memref<3x4x4x128xf32, #tpu.memory_space<vmem>>, %arg4: memref<2x2x4x128xf32, #tpu.memory_space<vmem>>) attributes {dimension_semantics = [#tpu.dimension_semantics<parallel>, #tpu.dimension_semantics<parallel>], iteration_bounds = array<i64: 1, 1>, scalar_prefetch = 0 : i64, scratch_operands = 0 : i64, tpu.core_type = #tpu.core_type<tc>, window_params = [{transform_indices = @transform_0, window_bounds = array<i64: 2, 4, 2, 128>}, {transform_indices = @transform_1, window_bounds = array<i64: 3, 4, 4, 128>}, {transform_indices = @transform_2, window_bounds = array<i64: 2, 2, 4, 128>}]} {
    %cst = arith.constant 0.000000e+00 : f32
    %0 = vector.broadcast %cst : f32 to vector<4x128xf32>
    %cst_0 = arith.constant 0.000000e+00 : f32
    %1 = vector.broadcast %cst_0 : f32 to vector<4x128xf32>
    %c0 = arith.constant 0 : index
    %c0_1 = arith.constant 0 : index
    %c0_2 = arith.constant 0 : index
    %c0_3 = arith.constant 0 : index
    %2 = vector.load %arg2[%c0, %c0_1, %c0_2, %c0_3] : memref<2x4x2x128xf32, #tpu.memory_space<vmem>>, vector<1x1x1x128xf32>
    %3 = vector.shape_cast %2 : vector<1x1x1x128xf32> to vector<1x128xf32>
    %c1 = arith.constant 1 : index
    %c0_4 = arith.constant 0 : index
    %c0_5 = arith.constant 0 : index
    %c0_6 = arith.constant 0 : index
    %4 = vector.load %arg2[%c1, %c0_4, %c0_5, %c0_6] : memref<2x4x2x128xf32, #tpu.memory_space<vmem>>, vector<1x1x1x128xf32>
    %5 = vector.shape_cast %4 : vector<1x1x1x128xf32> to vector<1x128xf32>
    %c0_7 = arith.constant 0 : index
    %c0_8 = arith.constant 0 : index
    %c0_9 = arith.constant 0 : index
    %c0_10 = arith.constant 0 : index
    %6 = vector.load %arg3[%c0_7, %c0_8, %c0_9, %c0_10] : memref<3x4x4x128xf32, #tpu.memory_space<vmem>>, vector<1x1x4x128xf32>
    %7 = vector.shape_cast %6 : vector<1x1x4x128xf32> to vector<4x128xf32>
    %c1_11 = arith.constant 1 : index
    %c0_12 = arith.constant 0 : index
    %c0_13 = arith.constant 0 : index
    %c0_14 = arith.constant 0 : index
    %8 = vector.load %arg3[%c1_11, %c0_12, %c0_13, %c0_14] : memref<3x4x4x128xf32, #tpu.memory_space<vmem>>, vector<1x1x4x128xf32>
    %9 = vector.shape_cast %8 : vector<1x1x4x128xf32> to vector<4x128xf32>
    %c2 = arith.constant 2 : index
    %c0_15 = arith.constant 0 : index
    %c0_16 = arith.constant 0 : index
    %c0_17 = arith.constant 0 : index
    %10 = vector.load %arg3[%c2, %c0_15, %c0_16, %c0_17] : memref<3x4x4x128xf32, #tpu.memory_space<vmem>>, vector<1x1x4x128xf32>
    %11 = vector.shape_cast %10 : vector<1x1x4x128xf32> to vector<4x128xf32>
    %12 = arith.addf %3, %5 : vector<1x128xf32>
    %13 = vector.broadcast %12 : vector<1x128xf32> to vector<4x128xf32>
    %14 = arith.mulf %13, %7 : vector<4x128xf32>
    %15 = vector.broadcast %5 : vector<1x128xf32> to vector<4x128xf32>
    %16 = arith.mulf %15, %11 : vector<4x128xf32>
    %17 = arith.subf %14, %16 : vector<4x128xf32>
    %18 = arith.addf %0, %17 : vector<4x128xf32>
    %19 = vector.broadcast %3 : vector<1x128xf32> to vector<4x128xf32>
    %20 = arith.mulf %19, %9 : vector<4x128xf32>
    %21 = arith.addf %14, %20 : vector<4x128xf32>
    %22 = arith.addf %1, %21 : vector<4x128xf32>
    %c0_18 = arith.constant 0 : index
    %c1_19 = arith.constant 1 : index
    %c0_20 = arith.constant 0 : index
    %c0_21 = arith.constant 0 : index
    %23 = vector.load %arg2[%c0_18, %c1_19, %c0_20, %c0_21] : memref<2x4x2x128xf32, #tpu.memory_space<vmem>>, vector<1x1x1x128xf32>
    %24 = vector.shape_cast %23 : vector<1x1x1x128xf32> to vector<1x128xf32>
    %c1_22 = arith.constant 1 : index
    %c1_23 = arith.constant 1 : index
    %c0_24 = arith.constant 0 : index
    %c0_25 = arith.constant 0 : index
    %25 = vector.load %arg2[%c1_22, %c1_23, %c0_24, %c0_25] : memref<2x4x2x128xf32, #tpu.memory_space<vmem>>, vector<1x1x1x128xf32>
    %26 = vector.shape_cast %25 : vector<1x1x1x128xf32> to vector<1x128xf32>
    %c0_26 = arith.constant 0 : index
    %c1_27 = arith.constant 1 : index
    %c0_28 = arith.constant 0 : index
    %c0_29 = arith.constant 0 : index
    %27 = vector.load %arg3[%c0_26, %c1_27, %c0_28, %c0_29] : memref<3x4x4x128xf32, #tpu.memory_space<vmem>>, vector<1x1x4x128xf32>
    %28 = vector.shape_cast %27 : vector<1x1x4x128xf32> to vector<4x128xf32>
    %c1_30 = arith.constant 1 : index
    %c1_31 = arith.constant 1 : index
    %c0_32 = arith.constant 0 : index
    %c0_33 = arith.constant 0 : index
    %29 = vector.load %arg3[%c1_30, %c1_31, %c0_32, %c0_33] : memref<3x4x4x128xf32, #tpu.memory_space<vmem>>, vector<1x1x4x128xf32>
    %30 = vector.shape_cast %29 : vector<1x1x4x128xf32> to vector<4x128xf32>
    %c2_34 = arith.constant 2 : index
    %c1_35 = arith.constant 1 : index
    %c0_36 = arith.constant 0 : index
    %c0_37 = arith.constant 0 : index
    %31 = vector.load %arg3[%c2_34, %c1_35, %c0_36, %c0_37] : memref<3x4x4x128xf32, #tpu.memory_space<vmem>>, vector<1x1x4x128xf32>
    %32 = vector.shape_cast %31 : vector<1x1x4x128xf32> to vector<4x128xf32>
    %33 = arith.addf %24, %26 : vector<1x128xf32>
    %34 = vector.broadcast %33 : vector<1x128xf32> to vector<4x128xf32>
    %35 = arith.mulf %34, %28 : vector<4x128xf32>
    %36 = vector.broadcast %26 : vector<1x128xf32> to vector<4x128xf32>
    %37 = arith.mulf %36, %32 : vector<4x128xf32>
    %38 = arith.subf %35, %37 : vector<4x128xf32>
    %39 = arith.addf %18, %38 : vector<4x128xf32>
    %40 = vector.broadcast %24 : vector<1x128xf32> to vector<4x128xf32>
    %41 = arith.mulf %40, %30 : vector<4x128xf32>
    %42 = arith.addf %35, %41 : vector<4x128xf32>
    %43 = arith.addf %22, %42 : vector<4x128xf32>
    %c0_38 = arith.constant 0 : index
    %c2_39 = arith.constant 2 : index
    %c0_40 = arith.constant 0 : index
    %c0_41 = arith.constant 0 : index
    %44 = vector.load %arg2[%c0_38, %c2_39, %c0_40, %c0_41] : memref<2x4x2x128xf32, #tpu.memory_space<vmem>>, vector<1x1x1x128xf32>
    %45 = vector.shape_cast %44 : vector<1x1x1x128xf32> to vector<1x128xf32>
    %c1_42 = arith.constant 1 : index
    %c2_43 = arith.constant 2 : index
    %c0_44 = arith.constant 0 : index
    %c0_45 = arith.constant 0 : index
    %46 = vector.load %arg2[%c1_42, %c2_43, %c0_44, %c0_45] : memref<2x4x2x128xf32, #tpu.memory_space<vmem>>, vector<1x1x1x128xf32>
    %47 = vector.shape_cast %46 : vector<1x1x1x128xf32> to vector<1x128xf32>
    %c0_46 = arith.constant 0 : index
    %c2_47 = arith.constant 2 : index
    %c0_48 = arith.constant 0 : index
    %c0_49 = arith.constant 0 : index
    %48 = vector.load %arg3[%c0_46, %c2_47, %c0_48, %c0_49] : memref<3x4x4x128xf32, #tpu.memory_space<vmem>>, vector<1x1x4x128xf32>
    %49 = vector.shape_cast %48 : vector<1x1x4x128xf32> to vector<4x128xf32>
    %c1_50 = arith.constant 1 : index
    %c2_51 = arith.constant 2 : index
    %c0_52 = arith.constant 0 : index
    %c0_53 = arith.constant 0 : index
    %50 = vector.load %arg3[%c1_50, %c2_51, %c0_52, %c0_53] : memref<3x4x4x128xf32, #tpu.memory_space<vmem>>, vector<1x1x4x128xf32>
    %51 = vector.shape_cast %50 : vector<1x1x4x128xf32> to vector<4x128xf32>
    %c2_54 = arith.constant 2 : index
    %c2_55 = arith.constant 2 : index
    %c0_56 = arith.constant 0 : index
    %c0_57 = arith.constant 0 : index
    %52 = vector.load %arg3[%c2_54, %c2_55, %c0_56, %c0_57] : memref<3x4x4x128xf32, #tpu.memory_space<vmem>>, vector<1x1x4x128xf32>
    %53 = vector.shape_cast %52 : vector<1x1x4x128xf32> to vector<4x128xf32>
    %54 = arith.addf %45, %47 : vector<1x128xf32>
    %55 = vector.broadcast %54 : vector<1x128xf32> to vector<4x128xf32>
    %56 = arith.mulf %55, %49 : vector<4x128xf32>
    %57 = vector.broadcast %47 : vector<1x128xf32> to vector<4x128xf32>
    %58 = arith.mulf %57, %53 : vector<4x128xf32>
    %59 = arith.subf %56, %58 : vector<4x128xf32>
    %60 = arith.addf %39, %59 : vector<4x128xf32>
    %61 = vector.broadcast %45 : vector<1x128xf32> to vector<4x128xf32>
    %62 = arith.mulf %61, %51 : vector<4x128xf32>
    %63 = arith.addf %56, %62 : vector<4x128xf32>
    %64 = arith.addf %43, %63 : vector<4x128xf32>
    %c0_58 = arith.constant 0 : index
    %c3 = arith.constant 3 : index
    %c0_59 = arith.constant 0 : index
    %c0_60 = arith.constant 0 : index
    %65 = vector.load %arg2[%c0_58, %c3, %c0_59, %c0_60] : memref<2x4x2x128xf32, #tpu.memory_space<vmem>>, vector<1x1x1x128xf32>
    %66 = vector.shape_cast %65 : vector<1x1x1x128xf32> to vector<1x128xf32>
    %c1_61 = arith.constant 1 : index
    %c3_62 = arith.constant 3 : index
    %c0_63 = arith.constant 0 : index
    %c0_64 = arith.constant 0 : index
    %67 = vector.load %arg2[%c1_61, %c3_62, %c0_63, %c0_64] : memref<2x4x2x128xf32, #tpu.memory_space<vmem>>, vector<1x1x1x128xf32>
    %68 = vector.shape_cast %67 : vector<1x1x1x128xf32> to vector<1x128xf32>
    %c0_65 = arith.constant 0 : index
    %c3_66 = arith.constant 3 : index
    %c0_67 = arith.constant 0 : index
    %c0_68 = arith.constant 0 : index
    %69 = vector.load %arg3[%c0_65, %c3_66, %c0_67, %c0_68] : memref<3x4x4x128xf32, #tpu.memory_space<vmem>>, vector<1x1x4x128xf32>
    %70 = vector.shape_cast %69 : vector<1x1x4x128xf32> to vector<4x128xf32>
    %c1_69 = arith.constant 1 : index
    %c3_70 = arith.constant 3 : index
    %c0_71 = arith.constant 0 : index
    %c0_72 = arith.constant 0 : index
    %71 = vector.load %arg3[%c1_69, %c3_70, %c0_71, %c0_72] : memref<3x4x4x128xf32, #tpu.memory_space<vmem>>, vector<1x1x4x128xf32>
    %72 = vector.shape_cast %71 : vector<1x1x4x128xf32> to vector<4x128xf32>
    %c2_73 = arith.constant 2 : index
    %c3_74 = arith.constant 3 : index
    %c0_75 = arith.constant 0 : index
    %c0_76 = arith.constant 0 : index
    %73 = vector.load %arg3[%c2_73, %c3_74, %c0_75, %c0_76] : memref<3x4x4x128xf32, #tpu.memory_space<vmem>>, vector<1x1x4x128xf32>
    %74 = vector.shape_cast %73 : vector<1x1x4x128xf32> to vector<4x128xf32>
    %75 = arith.addf %66, %68 : vector<1x128xf32>
    %76 = vector.broadcast %75 : vector<1x128xf32> to vector<4x128xf32>
    %77 = arith.mulf %76, %70 : vector<4x128xf32>
    %78 = vector.broadcast %68 : vector<1x128xf32> to vector<4x128xf32>
    %79 = arith.mulf %78, %74 : vector<4x128xf32>
    %80 = arith.subf %77, %79 : vector<4x128xf32>
    %81 = arith.addf %60, %80 : vector<4x128xf32>
    %82 = vector.broadcast %66 : vector<1x128xf32> to vector<4x128xf32>
    %83 = arith.mulf %82, %72 : vector<4x128xf32>
    %84 = arith.addf %77, %83 : vector<4x128xf32>
    %85 = arith.addf %64, %84 : vector<4x128xf32>
    %c0_77 = arith.constant 0 : index
    %c0_78 = arith.constant 0 : index
    %c0_79 = arith.constant 0 : index
    %c0_80 = arith.constant 0 : index
    %86 = vector.load %arg4[%c0_77, %c0_78, %c0_79, %c0_80] : memref<2x2x4x128xf32, #tpu.memory_space<vmem>>, vector<1x1x4x128xf32>
    %87 = vector.shape_cast %86 : vector<1x1x4x128xf32> to vector<4x128xf32>
    %88 = vector.shape_cast %81 : vector<4x128xf32> to vector<1x1x4x128xf32>
    tpu.vector_store %arg4[%c0_77, %c0_78, %c0_79, %c0_80], %88 {strides = array<i32>} : memref<2x2x4x128xf32, #tpu.memory_space<vmem>>, vector<1x1x4x128xf32>,
    %c1_81 = arith.constant 1 : index
    %c0_82 = arith.constant 0 : index
    %c0_83 = arith.constant 0 : index
    %c0_84 = arith.constant 0 : index
    %89 = vector.load %arg4[%c1_81, %c0_82, %c0_83, %c0_84] : memref<2x2x4x128xf32, #tpu.memory_space<vmem>>, vector<1x1x4x128xf32>
    %90 = vector.shape_cast %89 : vector<1x1x4x128xf32> to vector<4x128xf32>
    %91 = vector.shape_cast %85 : vector<4x128xf32> to vector<1x1x4x128xf32>
    tpu.vector_store %arg4[%c1_81, %c0_82, %c0_83, %c0_84], %91 {strides = array<i32>} : memref<2x2x4x128xf32, #tpu.memory_space<vmem>>, vector<1x1x4x128xf32>,
    %cst_85 = arith.constant 0.000000e+00 : f32
    %92 = vector.broadcast %cst_85 : f32 to vector<4x128xf32>
    %cst_86 = arith.constant 0.000000e+00 : f32
    %93 = vector.broadcast %cst_86 : f32 to vector<4x128xf32>
    %c0_87 = arith.constant 0 : index
    %c0_88 = arith.constant 0 : index
    %c1_89 = arith.constant 1 : index
    %c0_90 = arith.constant 0 : index
    %94 = vector.load %arg2[%c0_87, %c0_88, %c1_89, %c0_90] : memref<2x4x2x128xf32, #tpu.memory_space<vmem>>, vector<1x1x1x128xf32>
    %95 = vector.shape_cast %94 : vector<1x1x1x128xf32> to vector<1x128xf32>
    %c1_91 = arith.constant 1 : index
    %c0_92 = arith.constant 0 : index
    %c1_93 = arith.constant 1 : index
    %c0_94 = arith.constant 0 : index
    %96 = vector.load %arg2[%c1_91, %c0_92, %c1_93, %c0_94] : memref<2x4x2x128xf32, #tpu.memory_space<vmem>>, vector<1x1x1x128xf32>
    %97 = vector.shape_cast %96 : vector<1x1x1x128xf32> to vector<1x128xf32>
    %c0_95 = arith.constant 0 : index
    %c0_96 = arith.constant 0 : index
    %c0_97 = arith.constant 0 : index
    %c0_98 = arith.constant 0 : index
    %98 = vector.load %arg3[%c0_95, %c0_96, %c0_97, %c0_98] : memref<3x4x4x128xf32, #tpu.memory_space<vmem>>, vector<1x1x4x128xf32>
    %99 = vector.shape_cast %98 : vector<1x1x4x128xf32> to vector<4x128xf32>
    %c1_99 = arith.constant 1 : index
    %c0_100 = arith.constant 0 : index
    %c0_101 = arith.constant 0 : index
    %c0_102 = arith.constant 0 : index
    %100 = vector.load %arg3[%c1_99, %c0_100, %c0_101, %c0_102] : memref<3x4x4x128xf32, #tpu.memory_space<vmem>>, vector<1x1x4x128xf32>
    %101 = vector.shape_cast %100 : vector<1x1x4x128xf32> to vector<4x128xf32>
    %c2_103 = arith.constant 2 : index
    %c0_104 = arith.constant 0 : index
    %c0_105 = arith.constant 0 : index
    %c0_106 = arith.constant 0 : index
    %102 = vector.load %arg3[%c2_103, %c0_104, %c0_105, %c0_106] : memref<3x4x4x128xf32, #tpu.memory_space<vmem>>, vector<1x1x4x128xf32>
    %103 = vector.shape_cast %102 : vector<1x1x4x128xf32> to vector<4x128xf32>
    %104 = arith.addf %95, %97 : vector<1x128xf32>
    %105 = vector.broadcast %104 : vector<1x128xf32> to vector<4x128xf32>
    %106 = arith.mulf %105, %99 : vector<4x128xf32>
    %107 = vector.broadcast %97 : vector<1x128xf32> to vector<4x128xf32>
    %108 = arith.mulf %107, %103 : vector<4x128xf32>
    %109 = arith.subf %106, %108 : vector<4x128xf32>
    %110 = arith.addf %92, %109 : vector<4x128xf32>
    %111 = vector.broadcast %95 : vector<1x128xf32> to vector<4x128xf32>
    %112 = arith.mulf %111, %101 : vector<4x128xf32>
    %113 = arith.addf %106, %112 : vector<4x128xf32>
    %114 = arith.addf %93, %113 : vector<4x128xf32>
    %c0_107 = arith.constant 0 : index
    %c1_108 = arith.constant 1 : index
    %c1_109 = arith.constant 1 : index
    %c0_110 = arith.constant 0 : index
    %115 = vector.load %arg2[%c0_107, %c1_108, %c1_109, %c0_110] : memref<2x4x2x128xf32, #tpu.memory_space<vmem>>, vector<1x1x1x128xf32>
    %116 = vector.shape_cast %115 : vector<1x1x1x128xf32> to vector<1x128xf32>
    %c1_111 = arith.constant 1 : index
    %c1_112 = arith.constant 1 : index
    %c1_113 = arith.constant 1 : index
    %c0_114 = arith.constant 0 : index
    %117 = vector.load %arg2[%c1_111, %c1_112, %c1_113, %c0_114] : memref<2x4x2x128xf32, #tpu.memory_space<vmem>>, vector<1x1x1x128xf32>
    %118 = vector.shape_cast %117 : vector<1x1x1x128xf32> to vector<1x128xf32>
    %c0_115 = arith.constant 0 : index
    %c1_116 = arith.constant 1 : index
    %c0_117 = arith.constant 0 : index
    %c0_118 = arith.constant 0 : index
    %119 = vector.load %arg3[%c0_115, %c1_116, %c0_117, %c0_118] : memref<3x4x4x128xf32, #tpu.memory_space<vmem>>, vector<1x1x4x128xf32>
    %120 = vector.shape_cast %119 : vector<1x1x4x128xf32> to vector<4x128xf32>
    %c1_119 = arith.constant 1 : index
    %c1_120 = arith.constant 1 : index
    %c0_121 = arith.constant 0 : index
    %c0_122 = arith.constant 0 : index
    %121 = vector.load %arg3[%c1_119, %c1_120, %c0_121, %c0_122] : memref<3x4x4x128xf32, #tpu.memory_space<vmem>>, vector<1x1x4x128xf32>
    %122 = vector.shape_cast %121 : vector<1x1x4x128xf32> to vector<4x128xf32>
    %c2_123 = arith.constant 2 : index
    %c1_124 = arith.constant 1 : index
    %c0_125 = arith.constant 0 : index
    %c0_126 = arith.constant 0 : index
    %123 = vector.load %arg3[%c2_123, %c1_124, %c0_125, %c0_126] : memref<3x4x4x128xf32, #tpu.memory_space<vmem>>, vector<1x1x4x128xf32>
    %124 = vector.shape_cast %123 : vector<1x1x4x128xf32> to vector<4x128xf32>
    %125 = arith.addf %116, %118 : vector<1x128xf32>
    %126 = vector.broadcast %125 : vector<1x128xf32> to vector<4x128xf32>
    %127 = arith.mulf %126, %120 : vector<4x128xf32>
    %128 = vector.broadcast %118 : vector<1x128xf32> to vector<4x128xf32>
    %129 = arith.mulf %128, %124 : vector<4x128xf32>
    %130 = arith.subf %127, %129 : vector<4x128xf32>
    %131 = arith.addf %110, %130 : vector<4x128xf32>
    %132 = vector.broadcast %116 : vector<1x128xf32> to vector<4x128xf32>
    %133 = arith.mulf %132, %122 : vector<4x128xf32>
    %134 = arith.addf %127, %133 : vector<4x128xf32>
    %135 = arith.addf %114, %134 : vector<4x128xf32>
    %c0_127 = arith.constant 0 : index
    %c2_128 = arith.constant 2 : index
    %c1_129 = arith.constant 1 : index
    %c0_130 = arith.constant 0 : index
    %136 = vector.load %arg2[%c0_127, %c2_128, %c1_129, %c0_130] : memref<2x4x2x128xf32, #tpu.memory_space<vmem>>, vector<1x1x1x128xf32>
    %137 = vector.shape_cast %136 : vector<1x1x1x128xf32> to vector<1x128xf32>
    %c1_131 = arith.constant 1 : index
    %c2_132 = arith.constant 2 : index
    %c1_133 = arith.constant 1 : index
    %c0_134 = arith.constant 0 : index
    %138 = vector.load %arg2[%c1_131, %c2_132, %c1_133, %c0_134] : memref<2x4x2x128xf32, #tpu.memory_space<vmem>>, vector<1x1x1x128xf32>
    %139 = vector.shape_cast %138 : vector<1x1x1x128xf32> to vector<1x128xf32>
    %c0_135 = arith.constant 0 : index
    %c2_136 = arith.constant 2 : index
    %c0_137 = arith.constant 0 : index
    %c0_138 = arith.constant 0 : index
    %140 = vector.load %arg3[%c0_135, %c2_136, %c0_137, %c0_138] : memref<3x4x4x128xf32, #tpu.memory_space<vmem>>, vector<1x1x4x128xf32>
    %141 = vector.shape_cast %140 : vector<1x1x4x128xf32> to vector<4x128xf32>
    %c1_139 = arith.constant 1 : index
    %c2_140 = arith.constant 2 : index
    %c0_141 = arith.constant 0 : index
    %c0_142 = arith.constant 0 : index
    %142 = vector.load %arg3[%c1_139, %c2_140, %c0_141, %c0_142] : memref<3x4x4x128xf32, #tpu.memory_space<vmem>>, vector<1x1x4x128xf32>
    %143 = vector.shape_cast %142 : vector<1x1x4x128xf32> to vector<4x128xf32>
    %c2_143 = arith.constant 2 : index
    %c2_144 = arith.constant 2 : index
    %c0_145 = arith.constant 0 : index
    %c0_146 = arith.constant 0 : index
    %144 = vector.load %arg3[%c2_143, %c2_144, %c0_145, %c0_146] : memref<3x4x4x128xf32, #tpu.memory_space<vmem>>, vector<1x1x4x128xf32>
    %145 = vector.shape_cast %144 : vector<1x1x4x128xf32> to vector<4x128xf32>
    %146 = arith.addf %137, %139 : vector<1x128xf32>
    %147 = vector.broadcast %146 : vector<1x128xf32> to vector<4x128xf32>
    %148 = arith.mulf %147, %141 : vector<4x128xf32>
    %149 = vector.broadcast %139 : vector<1x128xf32> to vector<4x128xf32>
    %150 = arith.mulf %149, %145 : vector<4x128xf32>
    %151 = arith.subf %148, %150 : vector<4x128xf32>
    %152 = arith.addf %131, %151 : vector<4x128xf32>
    %153 = vector.broadcast %137 : vector<1x128xf32> to vector<4x128xf32>
    %154 = arith.mulf %153, %143 : vector<4x128xf32>
    %155 = arith.addf %148, %154 : vector<4x128xf32>
    %156 = arith.addf %135, %155 : vector<4x128xf32>
    %c0_147 = arith.constant 0 : index
    %c3_148 = arith.constant 3 : index
    %c1_149 = arith.constant 1 : index
    %c0_150 = arith.constant 0 : index
    %157 = vector.load %arg2[%c0_147, %c3_148, %c1_149, %c0_150] : memref<2x4x2x128xf32, #tpu.memory_space<vmem>>, vector<1x1x1x128xf32>
    %158 = vector.shape_cast %157 : vector<1x1x1x128xf32> to vector<1x128xf32>
    %c1_151 = arith.constant 1 : index
    %c3_152 = arith.constant 3 : index
    %c1_153 = arith.constant 1 : index
    %c0_154 = arith.constant 0 : index
    %159 = vector.load %arg2[%c1_151, %c3_152, %c1_153, %c0_154] : memref<2x4x2x128xf32, #tpu.memory_space<vmem>>, vector<1x1x1x128xf32>
    %160 = vector.shape_cast %159 : vector<1x1x1x128xf32> to vector<1x128xf32>
    %c0_155 = arith.constant 0 : index
    %c3_156 = arith.constant 3 : index
    %c0_157 = arith.constant 0 : index
    %c0_158 = arith.constant 0 : index
    %161 = vector.load %arg3[%c0_155, %c3_156, %c0_157, %c0_158] : memref<3x4x4x128xf32, #tpu.memory_space<vmem>>, vector<1x1x4x128xf32>
    %162 = vector.shape_cast %161 : vector<1x1x4x128xf32> to vector<4x128xf32>
    %c1_159 = arith.constant 1 : index
    %c3_160 = arith.constant 3 : index
    %c0_161 = arith.constant 0 : index
    %c0_162 = arith.constant 0 : index
    %163 = vector.load %arg3[%c1_159, %c3_160, %c0_161, %c0_162] : memref<3x4x4x128xf32, #tpu.memory_space<vmem>>, vector<1x1x4x128xf32>
    %164 = vector.shape_cast %163 : vector<1x1x4x128xf32> to vector<4x128xf32>
    %c2_163 = arith.constant 2 : index
    %c3_164 = arith.constant 3 : index
    %c0_165 = arith.constant 0 : index
    %c0_166 = arith.constant 0 : index
    %165 = vector.load %arg3[%c2_163, %c3_164, %c0_165, %c0_166] : memref<3x4x4x128xf32, #tpu.memory_space<vmem>>, vector<1x1x4x128xf32>
    %166 = vector.shape_cast %165 : vector<1x1x4x128xf32> to vector<4x128xf32>
    %167 = arith.addf %158, %160 : vector<1x128xf32>
    %168 = vector.broadcast %167 : vector<1x128xf32> to vector<4x128xf32>
    %169 = arith.mulf %168, %162 : vector<4x128xf32>
    %170 = vector.broadcast %160 : vector<1x128xf32> to vector<4x128xf32>
    %171 = arith.mulf %170, %166 : vector<4x128xf32>
    %172 = arith.subf %169, %171 : vector<4x128xf32>
    %173 = arith.addf %152, %172 : vector<4x128xf32>
    %174 = vector.broadcast %158 : vector<1x128xf32> to vector<4x128xf32>
    %175 = arith.mulf %174, %164 : vector<4x128xf32>
    %176 = arith.addf %169, %175 : vector<4x128xf32>
    %177 = arith.addf %156, %176 : vector<4x128xf32>
    %c0_167 = arith.constant 0 : index
    %c1_168 = arith.constant 1 : index
    %c0_169 = arith.constant 0 : index
    %c0_170 = arith.constant 0 : index
    %178 = vector.load %arg4[%c0_167, %c1_168, %c0_169, %c0_170] : memref<2x2x4x128xf32, #tpu.memory_space<vmem>>, vector<1x1x4x128xf32>
    %179 = vector.shape_cast %178 : vector<1x1x4x128xf32> to vector<4x128xf32>
    %180 = vector.shape_cast %173 : vector<4x128xf32> to vector<1x1x4x128xf32>
    tpu.vector_store %arg4[%c0_167, %c1_168, %c0_169, %c0_170], %180 {strides = array<i32>} : memref<2x2x4x128xf32, #tpu.memory_space<vmem>>, vector<1x1x4x128xf32>,
    %c1_171 = arith.constant 1 : index
    %c1_172 = arith.constant 1 : index
    %c0_173 = arith.constant 0 : index
    %c0_174 = arith.constant 0 : index
    %181 = vector.load %arg4[%c1_171, %c1_172, %c0_173, %c0_174] : memref<2x2x4x128xf32, #tpu.memory_space<vmem>>, vector<1x1x4x128xf32>
    %182 = vector.shape_cast %181 : vector<1x1x4x128xf32> to vector<4x128xf32>
    %183 = vector.shape_cast %177 : vector<4x128xf32> to vector<1x1x4x128xf32>
    tpu.vector_store %arg4[%c1_171, %c1_172, %c0_173, %c0_174], %183 {strides = array<i32>} : memref<2x2x4x128xf32, #tpu.memory_space<vmem>>, vector<1x1x4x128xf32>,
    return
  }
  func.func @transform_0(%arg0: i32, %arg1: i32) -> (i32, i32, i32, i32) {
    %c0_i32 = arith.constant 0 : i32
    %c0_i32_0 = arith.constant 0 : i32
    %c0_i32_1 = arith.constant 0 : i32
    %c0_i32_2 = arith.constant 0 : i32
    return %c0_i32, %c0_i32_0, %arg0, %c0_i32_1 : i32, i32, i32, i32
  }
  func.func @transform_1(%arg0: i32, %arg1: i32) -> (i32, i32, i32, i32) {
    %c0_i32 = arith.constant 0 : i32
    %c0_i32_0 = arith.constant 0 : i32
    %c0_i32_1 = arith.constant 0 : i32
    %c0_i32_2 = arith.constant 0 : i32
    return %c0_i32, %c0_i32_0, %arg1, %c0_i32_1 : i32, i32, i32, i32
  }
  func.func @transform_2(%arg0: i32, %arg1: i32) -> (i32, i32, i32, i32) {
    %c0_i32 = arith.constant 0 : i32
    %c0_i32_0 = arith.constant 0 : i32
    %c0_i32_1 = arith.constant 0 : i32
    return %c0_i32, %arg0, %arg1, %c0_i32_0 : i32, i32, i32, i32
  }
}

</mosaic_0001>

<bundles_post_ra>
// kernel: reverse.1
= control target key start
LH: loop header
LB: loop body
LE: loop exit
PB: predicated region body
PF: predicated region fallthrough
CT: control target
= control target key end

     0   :  { %v71_v3 = vlaneseq  ;;  %v64_v9 = vld [vmem:[#allocation0 + $0x7] ss:$-1 sm:$0xff]  ;;  %v78_v12 = vld [vmem:[#allocation0 + $0x17] ss:$-1 sm:$0xff]  ;;  %s329_s0 = inlined_call_operand.vmem [shape: f32[2,4,16,7], index: 0, kind: input, shape index: {}]   ;;  %s330_s1 = inlined_call_operand.vmem [shape: f32[2,4,16,7], index: 1, kind: output, shape index: {}]  }
   0x1   :  { %v44_v0 = vld [vmem:[%s329_s0] sm:$0xff]  ;;  %v46_v1 = vld [vmem:[%s329_s0 + $0x8] sm:$0xff]  ;;  %v48_v2 = vld [vmem:[%s329_s0 + $0x10] sm:$0xff]  ;;  %v65_v10 = vrot.slane %v64_v9, 1  ;;  %v79_v14 = vrot.slane %v78_v12, 1 }
   0x2   :  { %45 = vst [vmem:[#allocation0 + $0x8] sm:$0xff] %v44_v0  ;;  %47 = vst [vmem:[#allocation0 + $0x18] sm:$0xff] %v46_v1  ;;  %v50_v4 = vld [vmem:[%s329_s0 + $0x18] sm:$0xff]  ;;  %v52_v5 = vld [vmem:[%s329_s0 + $0x20] sm:$0xff]  ;;  %v72_v11 = vshrl.u32 %v71_v3, 7 }
   0x3   :  { %49 = vst [vmem:[#allocation0 + $0x28] sm:$0xff] %v48_v2  ;;  %v54_v6 = vld [vmem:[%s329_s0 + $0x28] sm:$0xff]  ;;  %51 = vst [vmem:[#allocation0 + $0x38] sm:$0xff] %v50_v4  ;;  %v56_v7 = vld [vmem:[%s329_s0 + $0x30] sm:$0xff] }
   0x4   :  { %53 = vst [vmem:[#allocation0 + $0x48] sm:$0xff] %v52_v5  ;;  %55 = vst [vmem:[#allocation0 + $0x58] sm:$0xff] %v54_v6  ;;  %v58_v8 = vld [vmem:[%s329_s0 + $0x38] sm:$0xff]  ;;  %v92_v13 = vld [vmem:[#allocation0 + $0x27] ss:$-1 sm:$0xff]  ;;  %vm73_vm0 = vcmp.lt.s32.totalorder %v72_v11, 7 }
   0x5   :  { %57 = vst [vmem:[#allocation0 + $0x68] sm:$0xff] %v56_v7  ;;  %59 = vst [vmem:[#allocation0 + $0x78] sm:$0xff] %v58_v8  ;;  %v93_v15 = vrot.slane %v92_v13, 1  ;;  %v106_v16 = vld [vmem:[#allocation0 + $0x37] ss:$-1 sm:$0xff] }
   0x6   :  { %66 = vst [vmem:[#allocation1] sm:$0xff] %v65_v10  ;;  %v107_v17 = vrot.slane %v106_v16, 1  ;;  %v120_v18 = vld [vmem:[#allocation0 + $0x47] ss:$-1 sm:$0xff]  ;;  %v134_v19 = vld [vmem:[#allocation0 + $0x57] ss:$-1 sm:$0xff] }
   0x7   :  { %80 = vst [vmem:[#allocation1 + $0x8] sm:$0xff] %v79_v14  ;;  %94 = vst [vmem:[#allocation1 + $0x10] sm:$0xff] %v93_v15  ;;  %v121_v20 = vrot.slane %v120_v18, 1  ;;  %v135_v21 = vrot.slane %v134_v19, 1  ;;  %v148_v22 = vld [vmem:[#allocation0 + $0x67] ss:$-1 sm:$0xff] }
   0x8   :  { %v162_v23 = vld [vmem:[#allocation0 + $0x77] ss:$-1 sm:$0xff]  ;;  %108 = vst [vmem:[#allocation1 + $0x18] sm:$0xff] %v107_v17  ;;  %v149_v24 = vrot.slane %v148_v22, 1 }
   0x9   :  { %v163_v25 = vrot.slane %v162_v23, 1  ;;  %v69_v26 = vld [vmem:[#allocation0 + $0xf] ss:$-1 sm:$0xff]  ;;  %v83_v27 = vld [vmem:[#allocation0 + $0x1f] ss:$-1 sm:$0xff]  ;;  %122 = vst [vmem:[#allocation1 + $0x20] sm:$0xff] %v121_v20 }
   0xa   :  { %v97_v28 = vld [vmem:[#allocation0 + $0x2f] ss:$-1 sm:$0xff]  ;;  %136 = vst [vmem:[#allocation1 + $0x28] sm:$0xff] %v135_v21  ;;  %v70_v29 = vrot.slane %v69_v26, 1  ;;  %v84_v30 = vrot.slane %v83_v27, 1  ;;  %150 = vst [vmem:[#allocation1 + $0x30] sm:$0xff] %v149_v24 }
   0xb   :  { %v98_v31 = vrot.slane %v97_v28, 1  ;;  %v111_v32 = vld [vmem:[#allocation0 + $0x3f] ss:$-1 sm:$0xff]  ;;  %164 = vst [vmem:[#allocation1 + $0x38] sm:$0xff] %v163_v25  ;;  %v125_v34 = vld [vmem:[#allocation0 + $0x4f] ss:$-1 sm:$0xff] }
   0xc   :  { %v112_v33 = vrot.slane %v111_v32, 1  ;;  %v139_v35 = vld [vmem:[#allocation0 + $0x5f] ss:$-1 sm:$0xff]  ;;  %74 = vst.msk [vmem:[#allocation1] sm:$0xff] %vm73_vm0, %v70_v29  ;;  %88 = vst.msk [vmem:[#allocation1 + $0x8] sm:$0xff] %vm73_vm0, %v84_v30  ;;  %v126_v36 = vrot.slane %v125_v34, 1 }
   0xd   :  { %102 = vst.msk [vmem:[#allocation1 + $0x10] sm:$0xff] %vm73_vm0, %v98_v31  ;;  %v140_v37 = vrot.slane %v139_v35, 1  ;;  %v153_v38 = vld [vmem:[#allocation0 + $0x6f] ss:$-1 sm:$0xff]  ;;  %v167_v39 = vld [vmem:[#allocation0 + $0x7f] ss:$-1 sm:$0xff] }
   0xe   :  { %116 = vst.msk [vmem:[#allocation1 + $0x18] sm:$0xff] %vm73_vm0, %v112_v33  ;;  %v154_v40 = vrot.slane %v153_v38, 1  ;;  %v168_v41 = vrot.slane %v167_v39, 1  ;;  %130 = vst.msk [vmem:[#allocation1 + $0x20] sm:$0xff] %vm73_vm0, %v126_v36 }
   0xf   :  { %144 = vst.msk [vmem:[#allocation1 + $0x28] sm:$0xff] %vm73_vm0, %v140_v37 }
  0x10   :  { %158 = vst.msk [vmem:[#allocation1 + $0x30] sm:$0xff] %vm73_vm0, %v154_v40  ;;  %172 = vst.msk [vmem:[#allocation1 + $0x38] sm:$0xff] %vm73_vm0, %v168_v41 }
  0x13   :  { %v214_v42 = vld [vmem:[#allocation1] sm:$0xff]  ;;  %v216_v43 = vld [vmem:[#allocation1 + $0x8] sm:$0xff] }
  0x14   :  { %v218_v44 = vld [vmem:[#allocation1 + $0x10] sm:$0xff]  ;;  %215 = vst [vmem:[%s330_s1] sm:$0xff] %v214_v42  ;;  %217 = vst [vmem:[%s330_s1 + $0x8] sm:$0xff] %v216_v43 }
  0x15   :  { %219 = vst [vmem:[%s330_s1 + $0x10] sm:$0xff] %v218_v44  ;;  %v220_v45 = vld [vmem:[#allocation1 + $0x18] sm:$0xff]  ;;  %v222_v46 = vld [vmem:[#allocation1 + $0x20] sm:$0xff] }
  0x16   :  { %221 = vst [vmem:[%s330_s1 + $0x18] sm:$0xff] %v220_v45  ;;  %v224_v47 = vld [vmem:[#allocation1 + $0x28] sm:$0xff]  ;;  %223 = vst [vmem:[%s330_s1 + $0x20] sm:$0xff] %v222_v46 }
  0x17   :  { %225 = vst [vmem:[%s330_s1 + $0x28] sm:$0xff] %v224_v47  ;;  %v226_v48 = vld [vmem:[#allocation1 + $0x30] sm:$0xff]  ;;  %v228_v49 = vld [vmem:[#allocation1 + $0x38] sm:$0xff] }
  0x18   :  { %227 = vst [vmem:[%s330_s1 + $0x30] sm:$0xff] %v226_v48  ;;  %229 = vst [vmem:[%s330_s1 + $0x38] sm:$0xff] %v228_v49 }

// kernel: spectral_conv2d_forward.1
= control target key start
LH: loop header
LB: loop body
LE: loop exit
PB: predicated region body
PF: predicated region fallthrough
CT: control target
= control target key end

     0   :  { %v20_v0 = vlaneseq  ;;  %s456_s0 = inlined_call_operand.vmem [shape: f32[2,4,2,128], index: 0, kind: input, shape index: {}]   ;;  %s457_s1 = inlined_call_operand.vmem [shape: f32[3,4,4,128], index: 1, kind: input, shape index: {}]   ;;  %s458_s2 = inlined_call_operand.vmem [shape: f32[2,2,4,128], index: 2, kind: output, shape index: {}]  }
   0x1   :  { %v11_v1 = vld [vmem:[%s456_s0] sm:$0x1]  ;;  %v240_v2 = vld [vmem:[%s456_s0 + $0x8] sm:$0x1]  ;;  %v243_v5 = vld [vmem:[%s456_s0 + $0x2] sm:$0x1] }
   0x2   :  { %v19_v3 = vadd.f32 %v240_v2, %v11_v1  ;;  %v21_v4 = vshrl.u32 %v20_v0, 7  ;;  %v14_v6 = vld [vmem:[%s457_s1] sm:$0xf]  ;;  %v244_v8 = vld [vmem:[%s456_s0 + $0xa] sm:$0x1] }
   0x3   :  { %v242_v7 = vld [vmem:[%s457_s1 + $0x20] sm:$0xf]  ;;  %v245_v9 = vld [vmem:[%s457_s1 + $0x4] sm:$0xf]  ;;  %v49_v11 = vadd.f32 %v244_v8, %v243_v5  ;;  %v249_v13 = vld [vmem:[%s456_s0 + $0xc] sm:$0x1] }
   0x4   :  { %v315_v10 = vsub.s32 0, %v21_v4  ;;  %v248_v12 = vld [vmem:[%s456_s0 + $0x4] sm:$0x1]  ;;  %v250_v15 = vld [vmem:[%s457_s1 + $0x8] sm:$0xf] }
   0x5   :  { %v247_v14 = vld [vmem:[%s457_s1 + $0x24] sm:$0xf]  ;;  %v79_v16 = vadd.f32 %v249_v13, %v248_v12  ;;  %v252_v22 = vld [vmem:[%s457_s1 + $0x28] sm:$0xf]  ;;  %v254_v23 = vld [vmem:[%s456_s0 + $0xe] sm:$0x1] }
   0x6   :  { %v253_v17 = vld [vmem:[%s456_s0 + $0x6] sm:$0x1]  ;;  %v23_v18 = vrot.slane %v19_v3, %v315_v10  ;;  %v28_v19 = vrot.slane %v240_v2, %v315_v10  ;;  %v53_v20 = vrot.slane %v49_v11, %v315_v10  ;;  %v58_v21 = vrot.slane %v244_v8, %v315_v10  ;;  %v257_v24 = vld [vmem:[%s457_s1 + $0x2c] sm:$0xf]  ;;  %v241_v34 = vld [vmem:[%s457_s1 + $0x10] sm:$0xf] }
   0x7   :  { %v83_v25 = vrot.slane %v79_v16, %v315_v10  ;;  %v88_v26 = vrot.slane %v249_v13, %v315_v10  ;;  %v109_v27 = vadd.f32 %v254_v23, %v253_v17  ;;  %v118_v28 = vrot.slane %v254_v23, %v315_v10  ;;  %v255_v33 = vld [vmem:[%s457_s1 + $0xc] sm:$0xf]  ;;  %v246_v39 = vld [vmem:[%s457_s1 + $0x14] sm:$0xf]  ;;  %v361_v40 = vld [vmem:[%s456_s0 + $0x1] sm:$0x1] }
   0x8   :  { %v24_v29 = vmul.f32 %v23_v18, %v14_v6  ;;  %v29_v30 = vmul.f32 %v242_v7, %v28_v19  ;;  %v54_v31 = vmul.f32 %v245_v9, %v53_v20  ;;  %v59_v32 = vmul.f32 %v247_v14, %v58_v21  ;;  %v259_v41 = vld [vmem:[%s456_s0 + $0x9] sm:$0x1]  ;;  %v251_v46 = vld [vmem:[%s457_s1 + $0x18] sm:$0xf]  ;;  %v256_v47 = vld [vmem:[%s457_s1 + $0x1c] sm:$0xf] }
   0x9   :  { %v84_v35 = vmul.f32 %v250_v15, %v83_v25  ;;  %v89_v36 = vmul.f32 %v252_v22, %v88_v26  ;;  %v113_v37 = vrot.slane %v109_v27, %v315_v10  ;;  %v119_v38 = vmul.f32 %v257_v24, %v118_v28  ;;  %v261_v55 = vld [vmem:[%s457_s1 + $0x20] sm:$0xf]  ;;  %v263_v58 = vld [vmem:[%s456_s0 + $0xb] sm:$0x1]  ;;  %v267_v0 = vld [vmem:[%s456_s0 + $0x5] sm:$0x1] }
   0xa   :  { %v30_v42 = vsub.f32 %v24_v29, %v29_v30  ;;  %v60_v43 = vsub.f32 %v54_v31, %v59_v32  ;;  %v35_v44 = vrot.slane %v11_v1, %v315_v10  ;;  %v65_v45 = vrot.slane %v243_v5, %v315_v10  ;;  %v262_v57 = vld [vmem:[%s456_s0 + $0x3] sm:$0x1]  ;;  %v268_v5 = vld [vmem:[%s456_s0 + $0xd] sm:$0x1]  ;;  %v272_v6 = vld [vmem:[%s456_s0 + $0x7] sm:$0x1] }
   0xb   :  { %v90_v48 = vsub.f32 %v84_v35, %v89_v36  ;;  %v114_v49 = vmul.f32 %v255_v33, %v113_v37  ;;  %v95_v50 = vrot.slane %v248_v12, %v315_v10  ;;  %v125_v51 = vrot.slane %v253_v17, %v315_v10  ;;  %v134_v62 = vld [vmem:[%s457_s1] sm:$0xf]  ;;  %v273_v7 = vld [vmem:[%s456_s0 + $0xf] sm:$0x1]  ;;  %v266_v12 = vld [vmem:[%s457_s1 + $0x24] sm:$0xf] }
   0xc   :  { %v61_v52 = vadd.f32 %v60_v43, %v30_v42  ;;  %v36_v53 = vmul.f32 %v241_v34, %v35_v44  ;;  %v66_v54 = vmul.f32 %v246_v39, %v65_v45  ;;  %v137_v56 = vadd.f32 %v259_v41, %v361_v40  ;;  %v264_v17 = vld [vmem:[%s457_s1 + $0x4] sm:$0xf]  ;;  %v271_v19 = vld [vmem:[%s457_s1 + $0x28] sm:$0xf]  ;;  %v276_v23 = vld [vmem:[%s457_s1 + $0x2c] sm:$0xf] }
   0xd   :  { %v120_v59 = vsub.f32 %v114_v49, %v119_v38  ;;  %v96_v60 = vmul.f32 %v251_v46, %v95_v50  ;;  %v126_v61 = vmul.f32 %v256_v47, %v125_v51  ;;  %v146_v63 = vrot.slane %v259_v41, %v315_v10  ;;  %v269_v28 = vld [vmem:[%s457_s1 + $0x8] sm:$0xf]  ;;  %v265_v36 = vld [vmem:[%s457_s1 + $0x14] sm:$0xf]  ;;  %v270_v42 = vld [vmem:[%s457_s1 + $0x18] sm:$0xf] }
   0xe   :  { %v91_v1 = vadd.f32 %v90_v48, %v61_v52  ;;  %v37_v2 = vadd.f32 %v36_v53, %v24_v29  ;;  %v67_v3 = vadd.f32 %v66_v54, %v54_v31  ;;  %v141_v4 = vrot.slane %v137_v56, %v315_v10  ;;  %v274_v29 = vld [vmem:[%s457_s1 + $0xc] sm:$0xf]  ;;  %v275_v47 = vld [vmem:[%s457_s1 + $0x1c] sm:$0xf] }
   0xf   :  { %v97_v8 = vadd.f32 %v96_v60, %v84_v35  ;;  %v127_v9 = vadd.f32 %v126_v61, %v114_v49  ;;  %v147_v11 = vmul.f32 %v261_v55, %v146_v63  ;;  %v162_v13 = vadd.f32 %v263_v58, %v262_v57  ;;  %v260_v35 = vld [vmem:[%s457_s1 + $0x10] sm:$0xf] }
  0x10   :  { %v121_v14 = vadd.f32 %v120_v59, %v91_v1  ;;  %v68_v15 = vadd.f32 %v67_v3, %v37_v2  ;;  %v142_v16 = vmul.f32 %v141_v4, %v134_v62  ;;  %v171_v18 = vrot.slane %v263_v58, %v315_v10 }
  0x11   :  { %v166_v20 = vrot.slane %v162_v13, %v315_v10  ;;  %v187_v21 = vadd.f32 %v268_v5, %v267_v0  ;;  %v196_v22 = vrot.slane %v268_v5, %v315_v10  ;;  %v212_v24 = vadd.f32 %v273_v7, %v272_v6 }
  0x12   :  { %129 = vst [vmem:[%s458_s2] sm:$0xf] %v121_v14  ;;  %v98_v25 = vadd.f32 %v97_v8, %v68_v15  ;;  %v148_v26 = vsub.f32 %v142_v16, %v147_v11  ;;  %v172_v27 = vmul.f32 %v266_v12, %v171_v18  ;;  %v221_v30 = vrot.slane %v273_v7, %v315_v10 }
  0x13   :  { %v167_v31 = vmul.f32 %v264_v17, %v166_v20  ;;  %v191_v32 = vrot.slane %v187_v21, %v315_v10  ;;  %v197_v33 = vmul.f32 %v271_v19, %v196_v22  ;;  %v216_v34 = vrot.slane %v212_v24, %v315_v10 }
  0x14   :  { %v128_v37 = vadd.f32 %v127_v9, %v98_v25  ;;  %v222_v38 = vmul.f32 %v276_v23, %v221_v30  ;;  %v153_v39 = vrot.slane %v361_v40, %v315_v10  ;;  %v178_v41 = vrot.slane %v262_v57, %v315_v10 }
  0x15   :  { %v173_v43 = vsub.f32 %v167_v31, %v172_v27  ;;  %v192_v44 = vmul.f32 %v269_v28, %v191_v32  ;;  %v217_v45 = vmul.f32 %v274_v29, %v216_v34  ;;  %v203_v46 = vrot.slane %v267_v0, %v315_v10 }
  0x16   :  { %258 = vst [vmem:[%s458_s2 + $0x8] sm:$0xf] %v128_v37  ;;  %v154_v40 = vmul.f32 %v260_v35, %v153_v39  ;;  %v179_v48 = vmul.f32 %v265_v36, %v178_v41  ;;  %v228_v49 = vrot.slane %v272_v6, %v315_v10 }
  0x17   :  { %v174_v50 = vadd.f32 %v173_v43, %v148_v26  ;;  %v198_v51 = vsub.f32 %v192_v44, %v197_v33  ;;  %v223_v52 = vsub.f32 %v217_v45, %v222_v38  ;;  %v204_v53 = vmul.f32 %v270_v42, %v203_v46 }
  0x18   :  { %v155_v54 = vadd.f32 %v154_v40, %v142_v16  ;;  %v180_v55 = vadd.f32 %v179_v48, %v167_v31  ;;  %v229_v56 = vmul.f32 %v275_v47, %v228_v49 }
  0x19   :  { %v199_v57 = vadd.f32 %v198_v51, %v174_v50  ;;  %v205_v58 = vadd.f32 %v204_v53, %v192_v44 }
  0x1a   :  { %v181_v59 = vadd.f32 %v180_v55, %v155_v54  ;;  %v230_v60 = vadd.f32 %v229_v56, %v217_v45 }
  0x1b   :  { %v224_v61 = vadd.f32 %v223_v52, %v199_v57 }
  0x1c   :  { %v206_v62 = vadd.f32 %v205_v58, %v181_v59 }
  0x1d   :  { %277 = vst [vmem:[%s458_s2 + $0x4] sm:$0xf] %v224_v61 }
  0x1e   :  { %v231_v63 = vadd.f32 %v230_v60, %v206_v62 }
  0x20   :  { %278 = vst [vmem:[%s458_s2 + $0xc] sm:$0xf] %v231_v63 }

</bundles_post_ra>
